<compile_context>
chip_gen: v7x
topology: tpu7x:2x2x1
jax: 0.10.0
libtpu: 0.0.40
codegen_flags: <defaults>
</compile_context>

<pallas_src>
import functools
import numpy as np
import jax
import jax.numpy as jnp
from jax.experimental import pallas as pl
from jax.experimental.pallas import tpu as pltpu


# ------------------ fused Conv1d(x3) + ReLU Pallas kernel -------------------

def _conv3_relu_kernel(x_ref, w1_ref, b1_ref, w2_ref, b2_ref, w3_ref, b3_ref,
                       o1_ref, o2_ref, o3_ref, *, L):
    # x_ref: (1, L+4, E) f32 — padded by 2 (max conv padding), shared by all convs.
    x = x_ref[0]                                              # (L+4, E) f32

    def conv(w_ref, b_ref, o_ref, k, pad):
        off = 2 - pad
        l_out = L + 2 * pad - k + 1
        acc = jnp.zeros((l_out, o_ref.shape[2]), jnp.float32)
        for j in range(k):                                    # static taps
            xs = x[off + j: off + j + l_out, :].astype(jnp.bfloat16)
            acc = acc + jnp.dot(xs, w_ref[j],                 # bf16 MXU, f32 acc
                                preferred_element_type=jnp.float32)
        o_ref[0] = jnp.maximum(acc + b_ref[...], 0.0).astype(o_ref.dtype)
        # TODO(synk): single im2col matmul per conv needs an in-kernel lane concat.

    conv(w1_ref, b1_ref, o1_ref, 3, 1)
    conv(w2_ref, b2_ref, o2_ref, 4, 1)
    conv(w3_ref, b3_ref, o3_ref, 5, 2)


def conv3_relu(x_nlc, params):
    """Fused conv1/conv2/conv3 + ReLU.  x_nlc: (B, L, E) f32 -> three (B, L_i, H) f32."""
    B, L, E = x_nlc.shape
    H = params["conv1_b"].shape[0]
    x_pad = jnp.pad(x_nlc, ((0, 0), (2, 2), (0, 0)))          # one shared padded buffer
    lp = L + 4
    bf16 = jnp.bfloat16
    w1 = jnp.transpose(params["conv1_w"], (2, 1, 0)).astype(bf16)   # (3, E, H)
    w2 = jnp.transpose(params["conv2_w"], (2, 1, 0)).astype(bf16)   # (4, E, H)
    w3 = jnp.transpose(params["conv3_w"], (2, 1, 0)).astype(bf16)   # (5, E, H)
    b1 = params["conv1_b"].reshape(1, H)
    b2 = params["conv2_b"].reshape(1, H)
    b3 = params["conv3_b"].reshape(1, H)
    l1, l2, l3 = L, L - 1, L
    kern = functools.partial(_conv3_relu_kernel, L=L)
    return pl.pallas_call(
        kern,
        out_shape=(jax.ShapeDtypeStruct((B, l1, H), jnp.float32),
                   jax.ShapeDtypeStruct((B, l2, H), jnp.float32),
                   jax.ShapeDtypeStruct((B, l3, H), jnp.float32)),
        grid=(B,),
        in_specs=[
            pl.BlockSpec((1, lp, E), lambda b: (b, 0, 0)),
            pl.BlockSpec((3, E, H), lambda b: (0, 0, 0)),
            pl.BlockSpec((1, H), lambda b: (0, 0)),
            pl.BlockSpec((4, E, H), lambda b: (0, 0, 0)),
            pl.BlockSpec((1, H), lambda b: (0, 0)),
            pl.BlockSpec((5, E, H), lambda b: (0, 0, 0)),
            pl.BlockSpec((1, H), lambda b: (0, 0)),
        ],
        out_specs=(pl.BlockSpec((1, l1, H), lambda b: (b, 0, 0)),
                   pl.BlockSpec((1, l2, H), lambda b: (b, 0, 0)),
                   pl.BlockSpec((1, l3, H), lambda b: (b, 0, 0))),
        compiler_params=pltpu.CompilerParams(
            dimension_semantics=("parallel",),
            vmem_limit_bytes=32 * 1024 * 1024),
    )(x_pad, w1, b1, w2, b2, w3, b3)


# --------------------- AdaptiveMaxPool1d(512) (glue) ------------------------
# Static window indices (PyTorch adaptive-pool formula); gather + max in JAX.

def adaptive_max_pool_seq(x_blh, out_size):
    """Max-pool over the length axis: (B, L, H) -> (B, out_size, H)."""
    L = x_blh.shape[1]
    i = np.arange(out_size)
    starts = (i * L) // out_size
    ends = -((-(i + 1) * L) // out_size)                      # ceil((i+1)*L/S)
    kmax = int(np.max(ends - starts))
    idx = starts[:, None] + np.arange(kmax)[None, :]
    idx = np.minimum(idx, (ends - 1)[:, None])                # (S, kmax), static
    gathered = x_blh[:, idx, :]                               # (B, S, kmax, H)
    return jnp.max(gathered, axis=2)                          # (B, S, H)


# ------------- batched BiLSTM + attention + classifier kernel ---------------

def _lstm_attn_cls_kernel(feats_ref,
                          wihf_ref, bf_ref, whhf_ref,
                          wihb_ref, bb_ref, whhb_ref,
                          wa1f_ref, wa1b_ref, ba1_ref, wa2_ref, ba2_ref,
                          wc1f_ref, wc1b_ref, bc1_ref, wc2_ref, bc2_ref,
                          out_ref,
                          gxf_ref, gxb_ref, hf_hist_ref, hb_hist_ref,
                          *, seq, hid, bt, unroll):
    f32, bf16 = jnp.float32, jnp.bfloat16
    h4 = 4 * hid

    # ---- (1) input projections for BOTH directions as one big MXU matmul each ----
    # feats block is (seq, bt, 3H) f32 with bt == 8 sublanes, so the leading-dim
    # merge/split reshapes below are layout preserving.
    feats2 = feats_ref[...].reshape(seq * bt, 3 * hid).astype(bf16)
    gxf_ref[...] = (jnp.dot(feats2, wihf_ref[...], preferred_element_type=f32)
                    + bf_ref[...]).reshape(seq, bt, h4)
    gxb_ref[...] = (jnp.dot(feats2, wihb_ref[...], preferred_element_type=f32)
                    + bb_ref[...]).reshape(seq, bt, h4)

    whhf = whhf_ref[...]                                      # hoist recurrent weights
    whhb = whhb_ref[...]

    def cell(gx, h, c, whh):
        # PyTorch LSTM gate order i, f, g, o; gate math in f32.
        g = gx + jnp.dot(h.astype(bf16), whh, preferred_element_type=f32)
        i_g = jax.nn.sigmoid(g[:, 0:hid])
        f_g = jax.nn.sigmoid(g[:, hid:2 * hid])
        g_g = jnp.tanh(g[:, 2 * hid:3 * hid])
        o_g = jax.nn.sigmoid(g[:, 3 * hid:4 * hid])
        c = f_g * c + i_g * g_g
        h = o_g * jnp.tanh(c)
        return h, c

    # ---- (2) fwd/bwd interleaved recurrence with full-slab history stores ----
    def one_step(t, carry):
        hf, cf, hb, cb = carry
        tb = seq - 1 - t
        hf, cf = cell(gxf_ref[t], hf, cf, whhf)               # forward  @ time t
        hb, cb = cell(gxb_ref[tb], hb, cb, whhb)              # backward @ time seq-1-t
        hf_hist_ref[t] = hf
        hb_hist_ref[tb] = hb
        return hf, cf, hb, cb

    def unrolled_body(tt, carry):
        for u in range(unroll):                               # manual unroll for ILP
            carry = one_step(tt * unroll + u, carry)
        return carry

    zero = jnp.zeros((bt, hid), f32)
    jax.lax.fori_loop(0, seq // unroll, unrolled_body, (zero, zero, zero, zero))

    # ---- (3) attention MLP + softmax over time + context (no 2H concat) ----
    lf = hf_hist_ref[...]                                     # (seq, bt, H) f32
    lb = hb_hist_ref[...]
    lf2 = lf.reshape(seq * bt, hid).astype(bf16)
    lb2 = lb.reshape(seq * bt, hid).astype(bf16)
    a1 = jnp.tanh(jnp.dot(lf2, wa1f_ref[...], preferred_element_type=f32)
                  + jnp.dot(lb2, wa1b_ref[...], preferred_element_type=f32)
                  + ba1_ref[...])
    scores = (jnp.dot(a1.astype(bf16), wa2_ref[...], preferred_element_type=f32)
              + ba2_ref[...])                                 # (seq*bt, 1)
    sc = scores.reshape(seq, bt, 1)
    sc = sc - jnp.max(sc, axis=0, keepdims=True)
    e = jnp.exp(sc)
    attn = e * (1.0 / jnp.sum(e, axis=0, keepdims=True))      # softmax over time axis
    ctx_f = jnp.sum(attn * lf, axis=0)                        # (bt, H)
    ctx_b = jnp.sum(attn * lb, axis=0)                        # (bt, H)

    # ---- (4) classifier: Linear -> ReLU -> (Dropout=identity) -> Linear -> Sigmoid ----
    h1 = jnp.maximum(
        jnp.dot(ctx_f.astype(bf16), wc1f_ref[...], preferred_element_type=f32)
        + jnp.dot(ctx_b.astype(bf16), wc1b_ref[...], preferred_element_type=f32)
        + bc1_ref[...], 0.0)
    logits = (jnp.dot(h1.astype(bf16), wc2_ref[...], preferred_element_type=f32)
              + bc2_ref[...])
    out_ref[...] = jax.nn.sigmoid(logits)


def lstm_attn_classifier(feats, params, hid, num_classes):
    """feats: (B, 512, 3H) f32 -> (B, num_classes) f32."""
    B, S, F3 = feats.shape
    bf16 = jnp.bfloat16

    BT = 8                                                    # sublane-aligned batch tile
    B_pad = ((B + BT - 1) // BT) * BT
    if B_pad != B:
        feats = jnp.pad(feats, ((0, B_pad - B), (0, 0), (0, 0)))
    feats_t = jnp.transpose(feats, (1, 0, 2)).astype(jnp.float32)   # time-major (S, B_pad, 3H)

    wa1, wc1 = params["wa1"], params["wc1"]                   # (2H, H) each, pre-split
    args = (feats_t,
            params["wihft"].astype(bf16), params["bf"], params["whhft"].astype(bf16),
            params["wihbt"].astype(bf16), params["bb"], params["whhbt"].astype(bf16),
            wa1[:hid].astype(bf16), wa1[hid:].astype(bf16), params["ba1"],
            params["wa2"].astype(bf16), params["ba2"],
            wc1[:hid].astype(bf16), wc1[hid:].astype(bf16), params["bc1"],
            params["wc2"].astype(bf16), params["bc2"])

    unroll = 4 if S % 4 == 0 else 1
    kern = functools.partial(_lstm_attn_cls_kernel,
                             seq=S, hid=hid, bt=BT, unroll=unroll)
    in_specs = [pl.BlockSpec((S, BT, F3), lambda bi: (0, bi, 0))]
    in_specs += [pl.BlockSpec(a.shape, lambda bi: (0, 0)) for a in args[1:]]  # all 2-D

    out = pl.pallas_call(
        kern,
        out_shape=jax.ShapeDtypeStruct((B_pad, num_classes), jnp.float32),
        grid=(B_pad // BT,),
        in_specs=in_specs,
        out_specs=pl.BlockSpec((BT, num_classes), lambda bi: (bi, 0)),
        scratch_shapes=[pltpu.VMEM((S, BT, 4 * hid), jnp.float32),   # gx forward
                        pltpu.VMEM((S, BT, 4 * hid), jnp.float32),   # gx backward
                        pltpu.VMEM((S, BT, hid), jnp.float32),       # h history fwd
                        pltpu.VMEM((S, BT, hid), jnp.float32)],      # h history bwd
        compiler_params=pltpu.CompilerParams(
            dimension_semantics=("parallel",),
            vmem_limit_bytes=32 * 1024 * 1024),
    )(*args)
    return out[:B]


# -------------------------------- full model --------------------------------

def bilstm_cnn_attention_forward(params, input_ids, hid, num_classes):
    emb = params["embedding"][input_ids]                      # (B, L, E) gather (glue)
    c1, c2, c3 = conv3_relu(emb, params)                      # conv + ReLU activations
    p1 = adaptive_max_pool_seq(c1, 512)
    p2 = adaptive_max_pool_seq(c2, 512)
    p3 = adaptive_max_pool_seq(c3, 512)
    feats = jnp.concatenate([p1, p2, p3], axis=-1)            # (B, 512, 3H)
    return lstm_attn_classifier(feats, params, hid, num_classes)   # (B, C)


# --------------------------- deterministic params ---------------------------

def init_params(key, vocab, E, H, C):
    ks = jax.random.split(key, 32)
    rnd = lambda k, shp: 0.1 * jax.random.normal(k, shp, jnp.float32)

    emb = rnd(ks[0], (vocab, E)).at[0].set(0.0)               # padding_idx=0

    conv1_w, conv1_b = rnd(ks[1], (H, E, 3)), rnd(ks[2], (H,))
    conv2_w, conv2_b = rnd(ks[3], (H, E, 4)), rnd(ks[4], (H,))
    conv3_w, conv3_b = rnd(ks[5], (H, E, 5)), rnd(ks[6], (H,))

    # BiLSTM (PyTorch gate order i, f, g, o), input size = 3H
    w_ih_f, w_hh_f = rnd(ks[7], (4 * H, 3 * H)), rnd(ks[8], (4 * H, H))
    b_ih_f, b_hh_f = rnd(ks[9], (4 * H,)), rnd(ks[10], (4 * H,))
    w_ih_b, w_hh_b = rnd(ks[11], (4 * H, 3 * H)), rnd(ks[12], (4 * H, H))
    b_ih_b, b_hh_b = rnd(ks[13], (4 * H,)), rnd(ks[14], (4 * H,))

    att_w1, att_b1 = rnd(ks[15], (H, 2 * H)), rnd(ks[16], (H,))
    att_w2, att_b2 = rnd(ks[17], (1, H)), rnd(ks[18], (1,))

    cls_w1, cls_b1 = rnd(ks[19], (H, 2 * H)), rnd(ks[20], (H,))
    cls_w2, cls_b2 = rnd(ks[21], (C, H)), rnd(ks[22], (C,))

    return {
        "embedding": emb,
        "conv1_w": conv1_w, "conv1_b": conv1_b,
        "conv2_w": conv2_w, "conv2_b": conv2_b,
        "conv3_w": conv3_w, "conv3_b": conv3_b,
        # pre-transposed for the y = x @ W^T + b form used in the kernels
        "wihft": w_ih_f.T, "whhft": w_hh_f.T, "bf": (b_ih_f + b_hh_f).reshape(1, 4 * H),
        "wihbt": w_ih_b.T, "whhbt": w_hh_b.T, "bb": (b_ih_b + b_hh_b).reshape(1, 4 * H),
        "wa1": att_w1.T, "ba1": att_b1.reshape(1, H),
        "wa2": att_w2.T, "ba2": att_b2.reshape(1, 1),
        "wc1": cls_w1.T, "bc1": cls_b1.reshape(1, H),
        "wc2": cls_w2.T, "bc2": cls_b2.reshape(1, C),
    }


if __name__ == "__main__":
    vocab_size, embedding_dim, hidden_dim, num_classes = 50, 16, 32, 3
    B, L = 2, 16

    key = jax.random.PRNGKey(0)
    pkey, ikey = jax.random.split(key)
    params = init_params(pkey, vocab_size, embedding_dim, hidden_dim, num_classes)
    input_ids = jax.random.randint(ikey, (B, L), 0, vocab_size, dtype=jnp.int32)

    out = bilstm_cnn_attention_forward(params, input_ids, hidden_dim, num_classes)
    out = jax.block_until_ready(out)
    assert out.shape == (B, num_classes)
    assert bool(jnp.all(jnp.isfinite(out)))
    print("KERNEL_OK")
</pallas_src>

<mosaic_0001>
module attributes {stable_mosaic.version = 11 : i64} {
  func.func @_conv3_relu_kernel(%arg0: i32, %arg1: memref<1x20x16xf32, #tpu.memory_space<vmem>>, %arg2: memref<3x16x32xbf16, #tpu.memory_space<vmem>>, %arg3: memref<1x32xf32, #tpu.memory_space<vmem>>, %arg4: memref<4x16x32xbf16, #tpu.memory_space<vmem>>, %arg5: memref<1x32xf32, #tpu.memory_space<vmem>>, %arg6: memref<5x16x32xbf16, #tpu.memory_space<vmem>>, %arg7: memref<1x32xf32, #tpu.memory_space<vmem>>, %arg8: memref<1x16x32xf32, #tpu.memory_space<vmem>>, %arg9: memref<1x15x32xf32, #tpu.memory_space<vmem>>, %arg10: memref<1x16x32xf32, #tpu.memory_space<vmem>>) attributes {dimension_semantics = [#tpu.dimension_semantics<parallel>], iteration_bounds = array<i64: 2>, scalar_prefetch = 0 : i64, scratch_operands = 0 : i64, tpu.core_type = #tpu.core_type<tc>, window_params = [{transform_indices = @transform_0, window_bounds = array<i64: 1, 20, 16>}, {pipeline_mode = #tpu.pipeline_mode<synchronous>, transform_indices = @transform_1, window_bounds = array<i64: 3, 16, 32>}, {pipeline_mode = #tpu.pipeline_mode<synchronous>, transform_indices = @transform_2, window_bounds = array<i64: 1, 32>}, {pipeline_mode = #tpu.pipeline_mode<synchronous>, transform_indices = @transform_3, window_bounds = array<i64: 4, 16, 32>}, {pipeline_mode = #tpu.pipeline_mode<synchronous>, transform_indices = @transform_4, window_bounds = array<i64: 1, 32>}, {pipeline_mode = #tpu.pipeline_mode<synchronous>, transform_indices = @transform_5, window_bounds = array<i64: 5, 16, 32>}, {pipeline_mode = #tpu.pipeline_mode<synchronous>, transform_indices = @transform_6, window_bounds = array<i64: 1, 32>}, {transform_indices = @transform_7, window_bounds = array<i64: 1, 16, 32>}, {transform_indices = @transform_8, window_bounds = array<i64: 1, 15, 32>}, {transform_indices = @transform_9, window_bounds = array<i64: 1, 16, 32>}]} {
    %c0 = arith.constant 0 : index
    %c0_0 = arith.constant 0 : index
    %c0_1 = arith.constant 0 : index
    %0 = vector.load %arg1[%c0, %c0_0, %c0_1] : memref<1x20x16xf32, #tpu.memory_space<vmem>>, vector<1x20x16xf32>
    %1 = vector.shape_cast %0 : vector<1x20x16xf32> to vector<20x16xf32>
    %cst = arith.constant 0.000000e+00 : f32
    %2 = vector.broadcast %cst : f32 to vector<16x32xf32>
    %3 = vector.extract_strided_slice %1 {offsets = [1, 0], sizes = [16, 16], strides = [1, 1]} : vector<20x16xf32> to vector<16x16xf32>
    %4 = arith.truncf %3 : vector<16x16xf32> to vector<16x16xbf16>
    %c0_2 = arith.constant 0 : index
    %c0_3 = arith.constant 0 : index
    %c0_4 = arith.constant 0 : index
    %5 = vector.load %arg2[%c0_2, %c0_3, %c0_4] : memref<3x16x32xbf16, #tpu.memory_space<vmem>>, vector<1x16x32xbf16>
    %6 = vector.shape_cast %5 : vector<1x16x32xbf16> to vector<16x32xbf16>
    %cst_5 = arith.constant dense<0.000000e+00> : vector<16x32xf32>
    %7 = tpu.matmul %4, %6, %cst_5 {dimension_numbers = #tpu.dot_dimension_numbers<[1], [0], [0], [1], [0, 0, 1, 1], [], []>} : vector<16x16xbf16>, vector<16x32xbf16>, vector<16x32xf32> -> vector<16x32xf32>
    %8 = arith.addf %2, %7 : vector<16x32xf32>
    %9 = vector.extract_strided_slice %1 {offsets = [2, 0], sizes = [16, 16], strides = [1, 1]} : vector<20x16xf32> to vector<16x16xf32>
    %10 = arith.truncf %9 : vector<16x16xf32> to vector<16x16xbf16>
    %c1 = arith.constant 1 : index
    %c0_6 = arith.constant 0 : index
    %c0_7 = arith.constant 0 : index
    %11 = vector.load %arg2[%c1, %c0_6, %c0_7] : memref<3x16x32xbf16, #tpu.memory_space<vmem>>, vector<1x16x32xbf16>
    %12 = vector.shape_cast %11 : vector<1x16x32xbf16> to vector<16x32xbf16>
    %cst_8 = arith.constant dense<0.000000e+00> : vector<16x32xf32>
    %13 = tpu.matmul %10, %12, %cst_8 {dimension_numbers = #tpu.dot_dimension_numbers<[1], [0], [0], [1], [0, 0, 1, 1], [], []>} : vector<16x16xbf16>, vector<16x32xbf16>, vector<16x32xf32> -> vector<16x32xf32>
    %14 = arith.addf %8, %13 : vector<16x32xf32>
    %15 = vector.extract_strided_slice %1 {offsets = [3, 0], sizes = [16, 16], strides = [1, 1]} : vector<20x16xf32> to vector<16x16xf32>
    %16 = arith.truncf %15 : vector<16x16xf32> to vector<16x16xbf16>
    %c2 = arith.constant 2 : index
    %c0_9 = arith.constant 0 : index
    %c0_10 = arith.constant 0 : index
    %17 = vector.load %arg2[%c2, %c0_9, %c0_10] : memref<3x16x32xbf16, #tpu.memory_space<vmem>>, vector<1x16x32xbf16>
    %18 = vector.shape_cast %17 : vector<1x16x32xbf16> to vector<16x32xbf16>
    %cst_11 = arith.constant dense<0.000000e+00> : vector<16x32xf32>
    %19 = tpu.matmul %16, %18, %cst_11 {dimension_numbers = #tpu.dot_dimension_numbers<[1], [0], [0], [1], [0, 0, 1, 1], [], []>} : vector<16x16xbf16>, vector<16x32xbf16>, vector<16x32xf32> -> vector<16x32xf32>
    %20 = arith.addf %14, %19 : vector<16x32xf32>
    %c0_12 = arith.constant 0 : index
    %c0_13 = arith.constant 0 : index
    %21 = vector.load %arg3[%c0_12, %c0_13] : memref<1x32xf32, #tpu.memory_space<vmem>>, vector<1x32xf32>
    %22 = vector.broadcast %21 : vector<1x32xf32> to vector<16x32xf32>
    %23 = arith.addf %20, %22 : vector<16x32xf32>
    %cst_14 = arith.constant 0.000000e+00 : f32
    %24 = vector.broadcast %cst_14 : f32 to vector<16x32xf32>
    %25 = arith.maximumf %23, %24 : vector<16x32xf32>
    %c0_15 = arith.constant 0 : index
    %c0_16 = arith.constant 0 : index
    %c0_17 = arith.constant 0 : index
    %26 = vector.load %arg8[%c0_15, %c0_16, %c0_17] : memref<1x16x32xf32, #tpu.memory_space<vmem>>, vector<1x16x32xf32>
    %27 = vector.shape_cast %26 : vector<1x16x32xf32> to vector<16x32xf32>
    %28 = vector.shape_cast %25 : vector<16x32xf32> to vector<1x16x32xf32>
    tpu.vector_store %arg8[%c0_15, %c0_16, %c0_17], %28 {strides = array<i32>} : memref<1x16x32xf32, #tpu.memory_space<vmem>>, vector<1x16x32xf32>,
    %cst_18 = arith.constant 0.000000e+00 : f32
    %29 = vector.broadcast %cst_18 : f32 to vector<15x32xf32>
    %30 = vector.extract_strided_slice %1 {offsets = [1, 0], sizes = [15, 16], strides = [1, 1]} : vector<20x16xf32> to vector<15x16xf32>
    %31 = arith.truncf %30 : vector<15x16xf32> to vector<15x16xbf16>
    %c0_19 = arith.constant 0 : index
    %c0_20 = arith.constant 0 : index
    %c0_21 = arith.constant 0 : index
    %32 = vector.load %arg4[%c0_19, %c0_20, %c0_21] : memref<4x16x32xbf16, #tpu.memory_space<vmem>>, vector<1x16x32xbf16>
    %33 = vector.shape_cast %32 : vector<1x16x32xbf16> to vector<16x32xbf16>
    %cst_22 = arith.constant dense<0.000000e+00> : vector<15x32xf32>
    %34 = tpu.matmul %31, %33, %cst_22 {dimension_numbers = #tpu.dot_dimension_numbers<[1], [0], [0], [1], [0, 0, 1, 1], [], []>} : vector<15x16xbf16>, vector<16x32xbf16>, vector<15x32xf32> -> vector<15x32xf32>
    %35 = arith.addf %29, %34 : vector<15x32xf32>
    %36 = vector.extract_strided_slice %1 {offsets = [2, 0], sizes = [15, 16], strides = [1, 1]} : vector<20x16xf32> to vector<15x16xf32>
    %37 = arith.truncf %36 : vector<15x16xf32> to vector<15x16xbf16>
    %c1_23 = arith.constant 1 : index
    %c0_24 = arith.constant 0 : index
    %c0_25 = arith.constant 0 : index
    %38 = vector.load %arg4[%c1_23, %c0_24, %c0_25] : memref<4x16x32xbf16, #tpu.memory_space<vmem>>, vector<1x16x32xbf16>
    %39 = vector.shape_cast %38 : vector<1x16x32xbf16> to vector<16x32xbf16>
    %cst_26 = arith.constant dense<0.000000e+00> : vector<15x32xf32>
    %40 = tpu.matmul %37, %39, %cst_26 {dimension_numbers = #tpu.dot_dimension_numbers<[1], [0], [0], [1], [0, 0, 1, 1], [], []>} : vector<15x16xbf16>, vector<16x32xbf16>, vector<15x32xf32> -> vector<15x32xf32>
    %41 = arith.addf %35, %40 : vector<15x32xf32>
    %42 = vector.extract_strided_slice %1 {offsets = [3, 0], sizes = [15, 16], strides = [1, 1]} : vector<20x16xf32> to vector<15x16xf32>
    %43 = arith.truncf %42 : vector<15x16xf32> to vector<15x16xbf16>
    %c2_27 = arith.constant 2 : index
    %c0_28 = arith.constant 0 : index
    %c0_29 = arith.constant 0 : index
    %44 = vector.load %arg4[%c2_27, %c0_28, %c0_29] : memref<4x16x32xbf16, #tpu.memory_space<vmem>>, vector<1x16x32xbf16>
    %45 = vector.shape_cast %44 : vector<1x16x32xbf16> to vector<16x32xbf16>
    %cst_30 = arith.constant dense<0.000000e+00> : vector<15x32xf32>
    %46 = tpu.matmul %43, %45, %cst_30 {dimension_numbers = #tpu.dot_dimension_numbers<[1], [0], [0], [1], [0, 0, 1, 1], [], []>} : vector<15x16xbf16>, vector<16x32xbf16>, vector<15x32xf32> -> vector<15x32xf32>
    %47 = arith.addf %41, %46 : vector<15x32xf32>
    %48 = vector.extract_strided_slice %1 {offsets = [4, 0], sizes = [15, 16], strides = [1, 1]} : vector<20x16xf32> to vector<15x16xf32>
    %49 = arith.truncf %48 : vector<15x16xf32> to vector<15x16xbf16>
    %c3 = arith.constant 3 : index
    %c0_31 = arith.constant 0 : index
    %c0_32 = arith.constant 0 : index
    %50 = vector.load %arg4[%c3, %c0_31, %c0_32] : memref<4x16x32xbf16, #tpu.memory_space<vmem>>, vector<1x16x32xbf16>
    %51 = vector.shape_cast %50 : vector<1x16x32xbf16> to vector<16x32xbf16>
    %cst_33 = arith.constant dense<0.000000e+00> : vector<15x32xf32>
    %52 = tpu.matmul %49, %51, %cst_33 {dimension_numbers = #tpu.dot_dimension_numbers<[1], [0], [0], [1], [0, 0, 1, 1], [], []>} : vector<15x16xbf16>, vector<16x32xbf16>, vector<15x32xf32> -> vector<15x32xf32>
    %53 = arith.addf %47, %52 : vector<15x32xf32>
    %c0_34 = arith.constant 0 : index
    %c0_35 = arith.constant 0 : index
    %54 = vector.load %arg5[%c0_34, %c0_35] : memref<1x32xf32, #tpu.memory_space<vmem>>, vector<1x32xf32>
    %55 = vector.broadcast %54 : vector<1x32xf32> to vector<15x32xf32>
    %56 = arith.addf %53, %55 : vector<15x32xf32>
    %cst_36 = arith.constant 0.000000e+00 : f32
    %57 = vector.broadcast %cst_36 : f32 to vector<15x32xf32>
    %58 = arith.maximumf %56, %57 : vector<15x32xf32>
    %c0_37 = arith.constant 0 : index
    %c0_38 = arith.constant 0 : index
    %c0_39 = arith.constant 0 : index
    %59 = vector.load %arg9[%c0_37, %c0_38, %c0_39] : memref<1x15x32xf32, #tpu.memory_space<vmem>>, vector<1x15x32xf32>
    %60 = vector.shape_cast %59 : vector<1x15x32xf32> to vector<15x32xf32>
    %61 = vector.shape_cast %58 : vector<15x32xf32> to vector<1x15x32xf32>
    tpu.vector_store %arg9[%c0_37, %c0_38, %c0_39], %61 {strides = array<i32>} : memref<1x15x32xf32, #tpu.memory_space<vmem>>, vector<1x15x32xf32>,
    %cst_40 = arith.constant 0.000000e+00 : f32
    %62 = vector.broadcast %cst_40 : f32 to vector<16x32xf32>
    %63 = vector.extract_strided_slice %1 {offsets = [0, 0], sizes = [16, 16], strides = [1, 1]} : vector<20x16xf32> to vector<16x16xf32>
    %64 = arith.truncf %63 : vector<16x16xf32> to vector<16x16xbf16>
    %c0_41 = arith.constant 0 : index
    %c0_42 = arith.constant 0 : index
    %c0_43 = arith.constant 0 : index
    %65 = vector.load %arg6[%c0_41, %c0_42, %c0_43] : memref<5x16x32xbf16, #tpu.memory_space<vmem>>, vector<1x16x32xbf16>
    %66 = vector.shape_cast %65 : vector<1x16x32xbf16> to vector<16x32xbf16>
    %cst_44 = arith.constant dense<0.000000e+00> : vector<16x32xf32>
    %67 = tpu.matmul %64, %66, %cst_44 {dimension_numbers = #tpu.dot_dimension_numbers<[1], [0], [0], [1], [0, 0, 1, 1], [], []>} : vector<16x16xbf16>, vector<16x32xbf16>, vector<16x32xf32> -> vector<16x32xf32>
    %68 = arith.addf %62, %67 : vector<16x32xf32>
    %69 = vector.extract_strided_slice %1 {offsets = [1, 0], sizes = [16, 16], strides = [1, 1]} : vector<20x16xf32> to vector<16x16xf32>
    %70 = arith.truncf %69 : vector<16x16xf32> to vector<16x16xbf16>
    %c1_45 = arith.constant 1 : index
    %c0_46 = arith.constant 0 : index
    %c0_47 = arith.constant 0 : index
    %71 = vector.load %arg6[%c1_45, %c0_46, %c0_47] : memref<5x16x32xbf16, #tpu.memory_space<vmem>>, vector<1x16x32xbf16>
    %72 = vector.shape_cast %71 : vector<1x16x32xbf16> to vector<16x32xbf16>
    %cst_48 = arith.constant dense<0.000000e+00> : vector<16x32xf32>
    %73 = tpu.matmul %70, %72, %cst_48 {dimension_numbers = #tpu.dot_dimension_numbers<[1], [0], [0], [1], [0, 0, 1, 1], [], []>} : vector<16x16xbf16>, vector<16x32xbf16>, vector<16x32xf32> -> vector<16x32xf32>
    %74 = arith.addf %68, %73 : vector<16x32xf32>
    %75 = vector.extract_strided_slice %1 {offsets = [2, 0], sizes = [16, 16], strides = [1, 1]} : vector<20x16xf32> to vector<16x16xf32>
    %76 = arith.truncf %75 : vector<16x16xf32> to vector<16x16xbf16>
    %c2_49 = arith.constant 2 : index
    %c0_50 = arith.constant 0 : index
    %c0_51 = arith.constant 0 : index
    %77 = vector.load %arg6[%c2_49, %c0_50, %c0_51] : memref<5x16x32xbf16, #tpu.memory_space<vmem>>, vector<1x16x32xbf16>
    %78 = vector.shape_cast %77 : vector<1x16x32xbf16> to vector<16x32xbf16>
    %cst_52 = arith.constant dense<0.000000e+00> : vector<16x32xf32>
    %79 = tpu.matmul %76, %78, %cst_52 {dimension_numbers = #tpu.dot_dimension_numbers<[1], [0], [0], [1], [0, 0, 1, 1], [], []>} : vector<16x16xbf16>, vector<16x32xbf16>, vector<16x32xf32> -> vector<16x32xf32>
    %80 = arith.addf %74, %79 : vector<16x32xf32>
    %81 = vector.extract_strided_slice %1 {offsets = [3, 0], sizes = [16, 16], strides = [1, 1]} : vector<20x16xf32> to vector<16x16xf32>
    %82 = arith.truncf %81 : vector<16x16xf32> to vector<16x16xbf16>
    %c3_53 = arith.constant 3 : index
    %c0_54 = arith.constant 0 : index
    %c0_55 = arith.constant 0 : index
    %83 = vector.load %arg6[%c3_53, %c0_54, %c0_55] : memref<5x16x32xbf16, #tpu.memory_space<vmem>>, vector<1x16x32xbf16>
    %84 = vector.shape_cast %83 : vector<1x16x32xbf16> to vector<16x32xbf16>
    %cst_56 = arith.constant dense<0.000000e+00> : vector<16x32xf32>
    %85 = tpu.matmul %82, %84, %cst_56 {dimension_numbers = #tpu.dot_dimension_numbers<[1], [0], [0], [1], [0, 0, 1, 1], [], []>} : vector<16x16xbf16>, vector<16x32xbf16>, vector<16x32xf32> -> vector<16x32xf32>
    %86 = arith.addf %80, %85 : vector<16x32xf32>
    %87 = vector.extract_strided_slice %1 {offsets = [4, 0], sizes = [16, 16], strides = [1, 1]} : vector<20x16xf32> to vector<16x16xf32>
    %88 = arith.truncf %87 : vector<16x16xf32> to vector<16x16xbf16>
    %c4 = arith.constant 4 : index
    %c0_57 = arith.constant 0 : index
    %c0_58 = arith.constant 0 : index
    %89 = vector.load %arg6[%c4, %c0_57, %c0_58] : memref<5x16x32xbf16, #tpu.memory_space<vmem>>, vector<1x16x32xbf16>
    %90 = vector.shape_cast %89 : vector<1x16x32xbf16> to vector<16x32xbf16>
    %cst_59 = arith.constant dense<0.000000e+00> : vector<16x32xf32>
    %91 = tpu.matmul %88, %90, %cst_59 {dimension_numbers = #tpu.dot_dimension_numbers<[1], [0], [0], [1], [0, 0, 1, 1], [], []>} : vector<16x16xbf16>, vector<16x32xbf16>, vector<16x32xf32> -> vector<16x32xf32>
    %92 = arith.addf %86, %91 : vector<16x32xf32>
    %c0_60 = arith.constant 0 : index
    %c0_61 = arith.constant 0 : index
    %93 = vector.load %arg7[%c0_60, %c0_61] : memref<1x32xf32, #tpu.memory_space<vmem>>, vector<1x32xf32>
    %94 = vector.broadcast %93 : vector<1x32xf32> to vector<16x32xf32>
    %95 = arith.addf %92, %94 : vector<16x32xf32>
    %cst_62 = arith.constant 0.000000e+00 : f32
    %96 = vector.broadcast %cst_62 : f32 to vector<16x32xf32>
    %97 = arith.maximumf %95, %96 : vector<16x32xf32>
    %c0_63 = arith.constant 0 : index
    %c0_64 = arith.constant 0 : index
    %c0_65 = arith.constant 0 : index
    %98 = vector.load %arg10[%c0_63, %c0_64, %c0_65] : memref<1x16x32xf32, #tpu.memory_space<vmem>>, vector<1x16x32xf32>
    %99 = vector.shape_cast %98 : vector<1x16x32xf32> to vector<16x32xf32>
    %100 = vector.shape_cast %97 : vector<16x32xf32> to vector<1x16x32xf32>
    tpu.vector_store %arg10[%c0_63, %c0_64, %c0_65], %100 {strides = array<i32>} : memref<1x16x32xf32, #tpu.memory_space<vmem>>, vector<1x16x32xf32>,
    return
  }
  func.func @transform_0(%arg0: i32) -> (i32, i32, i32) {
    %c0_i32 = arith.constant 0 : i32
    %c0_i32_0 = arith.constant 0 : i32
    %c0_i32_1 = arith.constant 0 : i32
    return %arg0, %c0_i32, %c0_i32_0 : i32, i32, i32
  }
  func.func @transform_1(%arg0: i32) -> (i32, i32, i32) {
    %c0_i32 = arith.constant 0 : i32
    %c0_i32_0 = arith.constant 0 : i32
    %c0_i32_1 = arith.constant 0 : i32
    %c0_i32_2 = arith.constant 0 : i32
    return %c0_i32, %c0_i32_0, %c0_i32_1 : i32, i32, i32
  }
  func.func @transform_2(%arg0: i32) -> (i32, i32) {
    %c0_i32 = arith.constant 0 : i32
    %c0_i32_0 = arith.constant 0 : i32
    %c0_i32_1 = arith.constant 0 : i32
    return %c0_i32, %c0_i32_0 : i32, i32
  }
  func.func @transform_3(%arg0: i32) -> (i32, i32, i32) {
    %c0_i32 = arith.constant 0 : i32
    %c0_i32_0 = arith.constant 0 : i32
    %c0_i32_1 = arith.constant 0 : i32
    %c0_i32_2 = arith.constant 0 : i32
    return %c0_i32, %c0_i32_0, %c0_i32_1 : i32, i32, i32
  }
  func.func @transform_4(%arg0: i32) -> (i32, i32) {
    %c0_i32 = arith.constant 0 : i32
    %c0_i32_0 = arith.constant 0 : i32
    %c0_i32_1 = arith.constant 0 : i32
    return %c0_i32, %c0_i32_0 : i32, i32
  }
  func.func @transform_5(%arg0: i32) -> (i32, i32, i32) {
    %c0_i32 = arith.constant 0 : i32
    %c0_i32_0 = arith.constant 0 : i32
    %c0_i32_1 = arith.constant 0 : i32
    %c0_i32_2 = arith.constant 0 : i32
    return %c0_i32, %c0_i32_0, %c0_i32_1 : i32, i32, i32
  }
  func.func @transform_6(%arg0: i32) -> (i32, i32) {
    %c0_i32 = arith.constant 0 : i32
    %c0_i32_0 = arith.constant 0 : i32
    %c0_i32_1 = arith.constant 0 : i32
    return %c0_i32, %c0_i32_0 : i32, i32
  }
  func.func @transform_7(%arg0: i32) -> (i32, i32, i32) {
    %c0_i32 = arith.constant 0 : i32
    %c0_i32_0 = arith.constant 0 : i32
    %c0_i32_1 = arith.constant 0 : i32
    return %arg0, %c0_i32, %c0_i32_0 : i32, i32, i32
  }
  func.func @transform_8(%arg0: i32) -> (i32, i32, i32) {
    %c0_i32 = arith.constant 0 : i32
    %c0_i32_0 = arith.constant 0 : i32
    %c0_i32_1 = arith.constant 0 : i32
    return %arg0, %c0_i32, %c0_i32_0 : i32, i32, i32
  }
  func.func @transform_9(%arg0: i32) -> (i32, i32, i32) {
    %c0_i32 = arith.constant 0 : i32
    %c0_i32_0 = arith.constant 0 : i32
    %c0_i32_1 = arith.constant 0 : i32
    return %arg0, %c0_i32, %c0_i32_0 : i32, i32, i32
  }
}

</mosaic_0001>

<bundles_post_ra>
// kernel: tpu_custom_call.1
= control target key start
LH: loop header
LB: loop body
LE: loop exit
PB: predicated region body
PF: predicated region fallthrough
CT: control target
= control target key end

     0   :  { %15 = vsyncpa [#allocation3], 0  ;;  %s1961_s0 = inlined_call_operand.vmem [shape: f32[2,20,16], index: 0, kind: input, shape index: {}]   ;;  %s1962_s1 = inlined_call_operand.hbm [shape: bf16[3,16,32], index: 1, kind: input, shape index: {}]   ;;  %s1963_s2 = inlined_call_operand.vmem [shape: f32[1,32], index: 2, kind: input, shape index: {}]   ;;  %s1964_s3 = inlined_call_operand.vmem [shape: bf16[4,16,32], index: 3, kind: input, shape index: {}]   ;;  %s1965_s4 = inlined_call_operand.vmem [shape: f32[1,32], index: 4, kind: input, shape index: {}]   ;;  %s1966_s5 = inlined_call_operand.vmem [shape: bf16[5,16,32], index: 5, kind: input, shape index: {}]   ;;  %s1967_s6 = inlined_call_operand.vmem [shape: f32[1,32], index: 6, kind: input, shape index: {}]   ;;  %s1968_s7 = inlined_call_operand.hbm [shape: f32[2,16,32], index: 7, kind: output, shape index: {0}]   ;;  %s1969_s8 = inlined_call_operand.vmem [shape: f32[2,15,32], index: 8, kind: output, shape index: {1}]   ;;  %s1970_s9 = inlined_call_operand.hbm [shape: f32[2,16,32], index: 9, kind: output, shape index: {2}]  }
   0x1   :  { %16 = vsyncpa [#allocation4], 0 }
   0x2   :  { %18 = vsyncpa [#allocation4 + $0x1], 0 }
   0x3   :  { %19 = vsyncpa [#allocation7], 0 }
   0x4   :  { %21 = vsyncpa [#allocation7 + $0x1], 0  ;;  %s1670_s30 = smov 0   ;;  %s1672_s10 = smov 0  }
   0x5   :  { %s1674_s11 = smov 0   ;;  %s1676_s12 = smov 0  }
   0x6 LB: > { %s1691_s13 = sadd.s32 4294967295, %s1609_s12   ;;  %s1250_s14 = sadd.s32 4294967294, %s1609_s12   ;;  %s1609_s12 = sphi %s1676_s12, %s1993_s12   ;;  %s1605_s11 = sphi %s1674_s11, %s1992_s11   ;;  %s1601_s10 = sphi %s1672_s10, %s1991_s10   ;;  %s1597_s30 = sphi %s1670_s30, %s1990_s30  }
   0x7   : > { %s1695_s15 = sadd.s32 1, %s1609_s12   ;;  %s186_s16 = sadd.s32 1, %s1605_s11 }
   0x8   : > { %s183_s17 = ssub.s32 %s1609_s12, %s1695_s15  ;;  %p196_p0 = scmp.ne.s32.totalorder %s1605_s11, %s1601_s10 }
   0x9   : > { %p184_p1 = scmp.eq.s32.totalorder %s183_s17, 0  ;;  %p197_p2 = scmp.eq.s32.totalorder %s1691_s13, 1 }
   0xa   : > { %p202_p3 = scmp.ne.s32.totalorder %s1601_s10, %s1597_s30  ;;  %p203_p4 = scmp.eq.s32.totalorder %s1250_s14, 1 }
   0xb   : > { %s1706_s18 = scalar_select %p184_p1, %s1605_s11, %s186_s16  }
   0xc   : > { %p1708_p5 = por %p197_p2, %p196_p0  ;;  %p1712_p6 = por %p203_p4, %p202_p3 }
   0xd   : > { %p1251_p7 = scmp.ge.s32.totalorder %s1609_s12, 1  ;;  %p262_p8 = scmp.lt.s32.totalorder %s1609_s12, 3 }
   0xe   : > { %s1977_s19 = scalar_select %p1708_p5, 1, 0 }
   0xf   : > { %s1978_s20 = scalar_select %p1712_p6, 1, 0 }
  0x10   : > { %p1971_p9 = scmp.eq.s32.totalorder %s1691_s13, 0  ;;  %p1719_p10 = pnand %p1251_p7, %p262_p8 }
  0x11   : > { %s1611_s22 = smov [#allocation2]   ;;  %s1483_s27 = scalar_lea.hbm %s1962_s1, 384 }
  0x12   : > { %s1979_s21 = scalar_select %p1719_p10, 1, 0 }
  0x13   : > { %s274_s23 = sshll.u32 %s1611_s22, 4  ;;  %p1418_p11 = pneg %p1719_p10  ;;  %s275_s23 = int_to_ptr.vmem [resolvable:$true] %s274_s23 }
  0x14   : > { %p1484_p13 = scmp.ne.s32.totalorder %s1962_s1, %s1483_s27  ;;  %p1490_p3 = scmp.lt.u32.totalorder %s1483_s27, %s1962_s1 }
  0x15   : > { %p1727_p12 = pnand %p1971_p9, %p1418_p11 }
  0x17   : > { %p1485_p0 = pneg %p1727_p12 }
  0x19   : > { %p1486_p1 = pnand %p1485_p0, %p1484_p13 }
  0x1b   : > { %p1487_p2 = pneg %p1486_p1 }
  0x1d   : > { %p1492_p4 = pnand %p1490_p3, %p1487_p2 }
  0x1f   : > { %1495 = shalt.err (!%p1492_p4)
}
  0x20   : > { %s1496_s17 = scalar_lea.vmem %s275_s23, 384  ;;  %p1504_p9 = scmp.lt.s32.totalorder %s275_s23, %s275_s23 }
  0x21   : > { %p1497_p7 = scmp.ne.s32.totalorder %s275_s23, %s1496_s17  ;;  %p1505_p6 = scmp.lt.s32.totalorder %s1496_s17, %s1496_s17 }
  0x23   : > { %p1499_p8 = pnand %p1497_p7, %p1485_p0  ;;  %p1506_p5 = por %p1505_p6, %p1504_p9 }
  0x25   : > { %p1500_p11 = pneg %p1499_p8 }
  0x27   : > { %p1507_p10 = pnand %p1506_p5, %p1500_p11 }
  0x29   : > { %1510 = shalt.err (!%p1507_p10)
}
  0x2a   : > { %s1612_s22 = smov 64   ;;  %s1613_s25 = smov 4  }
  0x2b   : > { %1421 = dma.hbm_to_vmem [thread:$0]  (!%p1727_p12), %s1962_s1, 384, %s275_s23, [#allocation3], %s1612_s22, %s1612_s22, %s1613_s25  }
  0x2c   : > { %p1981_p13 = scmp.ne.s32.totalorder %s1979_s21, 0 }
  0x2d   : > { %p1982_p1 = scmp.eq.s32.totalorder (!%p1981_p13), %s1691_s13, 0 }
  0x2e   : > { %313 = sbr.rel (%p1981_p13) target bundleno = 346 (0x15a), region = 48 }
  0x35   : > { %1584 = dma.done.wait (%p1982_p1), [#allocation3], 384   ;;  %p1983_p0 = pmov %p1982_p1 }
  0x36   : > { %p359_p5 = scmp.lt.s32.totalorder %s1691_s13, 1  ;;  %v1614_v0 = vmov 0.0   ;;  %vm1615_vm0 = vmmov 0   ;;  %v1471_v1 = vld [vmem:[#allocation2 + $0x8] sm:$0xff]   ;;  %vm437_vm1 = vsmask.f32 7424 }
  0x37   : > { %1586 = vsyncadd (%p1983_p0), [#allocation3], 4294966912  ;;  %1337 = vmatprep.subr.bf16.mxu0 %v1614_v0  ;;  %1339 = vmatprep.mubr.msk.bf16.mxu0 %vm1615_vm0, %v1614_v0  ;;  %vm382_vm2 = vcmask 1046528   ;;  %v1472_v7 = vld [vmem:[#allocation2] sm:$0xff]   ;;  %vm392_vm3 = vcmask 130048   ;;  %v1473_v8 = vld [vmem:[#allocation2 + $0x10] sm:$0xff]  }
  0x38   : > { %1343 = vmatprep.subr.bf16.mxu1 %v1614_v0  ;;  %s1759_s21 = scalar_select %p359_p5, %s1691_s13, 1  ;;  %1345 = vmatprep.mubr.msk.bf16.mxu1 %vm1615_vm0, %v1614_v0  ;;  %vm503_vm4 = vsmask.f32 6400  ;;  %v1474_v21 = vld [vmem:[%s1964_s3 + $0x8] sm:$0xff]   ;;  %v1475_v28 = vld [vmem:[%s1964_s3] sm:$0xff]   ;;  %v1476_v29 = vld [vmem:[%s1964_s3 + $0x10] sm:$0xff]  }
  0x39   : > { %1338 = vmatpush3.bf16.msra.mxu0 %v1471_v1  ;;  %1344 = vmatpush3.bf16.msra.mxu1 %v1472_v7  ;;  %v1477_v30 = vld [vmem:[%s1964_s3 + $0x18] sm:$0xff]   ;;  %v1478_v31 = vld [vmem:[%s1966_s5 + $0x8] sm:$0xff]   ;;  %vm736_vm5 = vcmask 1045504   ;;  %v1479_v35 = vld [vmem:[%s1966_s5] sm:$0xff]   ;;  %s1974_s14 = sshll.u32 %s1691_s13, 8  ;;  %vm576_vm6 = vcmask 261120  }
  0x3a   : > { %s1409_s23 = smul.u32 24, %s1759_s21  ;;  %1349 = vmatprep.subr.bf16.mxu0 %v1614_v0  ;;  %1355 = vmatprep.subr.bf16.mxu1 %v1614_v0  ;;  %v1480_v36 = vld [vmem:[%s1966_s5 + $0x10] sm:$0xff]   ;;  %v1481_v37 = vld [vmem:[%s1966_s5 + $0x18] sm:$0xff]   ;;  %v1482_v38 = vld [vmem:[%s1966_s5 + $0x20] sm:$0xff]   ;;  %s1860_s26 = scalar_lea.hbm %s1968_s7, %s1974_s14 }
  0x3b   : > { %v1267_v50 = vld [vmem:[%s1963_s2] ss:$0 sm:$0xff]  ;;  %p1984_p9 = scmp.ne.s32.totalorder %s1977_s19, 0 }
  0x3c   : > { %s363_s29 = scalar_lea.vmem %s1961_s0, %s1409_s23  ;;  %s1846_s23 = sand.u32 1, %s1601_s10  }
  0x3d   : > { %v370_v2 = vld [vmem:[%s363_s29] sm:$0xff]  ;;  %v371_v3 = vld [vmem:[%s363_s29 + $0x8] sm:$0xff]  ;;  %v372_v4 = vld [vmem:[%s363_s29 + $0x10] sm:$0xf]  ;;  %s1975_s24 = sshll.u32 %s1846_s23, 4  ;;  %s1616_s29 = smov [#allocation5]  }
  0x3e   : > { %v1767_v5 = vpack.c.bf16 %v371_v3, %v370_v2  ;;  %v374_v6 = vpack.c.bf16 %v372_v4, %v372_v4  ;;  %s344_s16 = scalar_lea.vmem [#allocation5], %s1975_s24  ;;  %s1515_s22 = sshll.u32 %s1616_s29, 4  ;;  %s1516_s22 = int_to_ptr.vmem [resolvable:$false] %s1515_s22 }
  0x3f   : > { %s1100_s17 = sshll.u32 %s344_s16, 4  ;;  %s1517_s25 = scalar_lea.vmem %s1516_s22, 512  ;;  %s1862_s17 = int_to_ptr.vmem [resolvable:$true] %s1100_s17 }
  0x40   : > { %v383_v9 = vrot.slane %v1767_v5, 1  ;;  %v384_v10 = vrot.slane %v374_v6, 1  ;;  %v439_v11 = vshrl.u32 %v1767_v5, 16  ;;  %v441_v12 = vshll.u32 %v1767_v5, 16  ;;  %s1511_s27 = scalar_lea.vmem %s1862_s17, 256  ;;  %p1518_p2 = scmp.lt.s32.totalorder %s1862_s17, %s1516_s22 }
  0x41   : > { %v446_v13 = vshll.u32 %v374_v6, 16  ;;  %v507_v14 = vshrl.u32 %v374_v6, 16  ;;  %v737_v32 = vrot.slane %v1767_v5, 2  ;;  %v738_v33 = vrot.slane %v374_v6, 2  ;;  %p1512_p6 = scmp.ne.s32.totalorder %s1862_s17, %s1511_s27  ;;  %p1519_p3 = scmp.lt.s32.totalorder %s1517_s25, %s1511_s27 }
  0x42   : > { %v385_v15 = vsel %vm382_vm2, %v383_v9, %v384_v10  ;;  %v443_v16 = vrot.slane %v441_v12, 1  ;;  %v504_v17 = vrot.slane %v439_v11, 1  ;;  %v505_v18 = vrot.slane %v441_v12, 2 }
  0x43   : > { %1340 = vmatmul.mubr.msk.bf16.vlgmr.msra.gmra.mrb[0].mxu0 %vm392_vm3, %v385_v15  ;;  %v448_v19 = vrot.slane %v446_v13, 1  ;;  %v510_v20 = vrot.slane %v446_v13, 2  ;;  %v509_v22 = vrot.slane %v507_v14, 1  ;;  %v739_v34 = vsel %vm736_vm5, %v737_v32, %v738_v33  ;;  %p1513_p10 = pnand %p1512_p6, %p1984_p9  ;;  %p1520_p4 = por %p1519_p3, %p1518_p2 }
  0x44   : > { %1350 = vmatpush3.bf16.msra.mxu0 %v1473_v8  ;;  %v444_v23 = vor.u32 %v443_v16, %v439_v11  ;;  %1351 = vmatprep.mubr.msk.bf16.mxu0 %vm1615_vm0, %v1614_v0  ;;  %v506_v24 = vor.u32 %v505_v18, %v504_v17 }
  0x45   : > { %v511_v25 = vor.u32 %v510_v20, %v509_v22  ;;  %1361 = vmatprep.subr.bf16.mxu0 %v1614_v0  ;;  %p1514_p12 = pneg %p1513_p10 }
  0x46   : > { %v449_v26 = vsel %vm437_vm1, %v444_v23, %v448_v19 }
  0x47   : > { %1346 = vmatmul.mubr.msk.bf16.vlgmr.msra.gmra.mrb[0].mxu1 %vm392_vm3, %v449_v26  ;;  %v512_v27 = vsel %vm503_vm4, %v506_v24, %v511_v25  ;;  %p1521_p7 = pnand %p1520_p4, %p1514_p12 }
  0x48   : > { %1356 = vmatpush3.bf16.msra.mxu1 %v1474_v21  ;;  %1357 = vmatprep.mubr.msk.bf16.mxu1 %vm1615_vm0, %v1614_v0 }
  0x49   : > { %1367 = vmatprep.subr.bf16.mxu1 %v1614_v0 }
  0x4b   : > { %1352 = vmatmul.mubr.msk.bf16.vlgmr.msra.gmra.mrb[4].mxu0 %vm392_vm3, %v512_v27 }
  0x4c   : > { %1362 = vmatpush3.bf16.msra.mxu0 %v1475_v28  ;;  %1363 = vmatprep.mubr.msk.bf16.mxu0 %vm1615_vm0, %v1614_v0 }
  0x4d   : > { %1373 = vmatprep.subr.bf16.mxu0 %v1614_v0 }
  0x4f   : > { %1358 = vmatmul.mubr.msk.bf16.vlgmr.msra.gmra.mrb[4].mxu1 %vm392_vm3, %v385_v15 }
  0x50   : > { %1368 = vmatpush3.bf16.msra.mxu1 %v1476_v29  ;;  %1369 = vmatprep.mubr.msk.bf16.mxu1 %vm1615_vm0, %v1614_v0 }
  0x51   : > { %1379 = vmatprep.subr.bf16.mxu1 %v1614_v0 }
  0x53   : > { %1364 = vmatmul.mubr.msk.bf16.vlgmr.msra.gmra.mrb[8].mxu0 %vm392_vm3, %v444_v23 }
  0x54   : > { %1374 = vmatpush3.bf16.msra.mxu0 %v1477_v30  ;;  %1375 = vmatprep.mubr.msk.bf16.mxu0 %vm1615_vm0, %v1614_v0 }
  0x55   : > { %1385 = vmatprep.subr.bf16.mxu0 %v1614_v0 }
  0x57   : > { %1370 = vmatmul.mubr.msk.bf16.vlgmr.msra.gmra.mrb[8].mxu1 %vm392_vm3, %v512_v27 }
  0x58   : > { %1380 = vmatpush3.bf16.msra.mxu1 %v1478_v31  ;;  %1381 = vmatprep.mubr.msk.bf16.mxu1 %vm1615_vm0, %v1614_v0 }
  0x59   : > { %1391 = vmatprep.subr.bf16.mxu1 %v1614_v0 }
  0x5b   : > { %1376 = vmatmul.mubr.msk.bf16.vlgmr.msra.gmra.mrb[12].mxu0 %vm392_vm3, %v739_v34 }
  0x5c   : > { %1386 = vmatpush3.bf16.msra.mxu0 %v1479_v35  ;;  %1387 = vmatprep.mubr.msk.bf16.mxu0 %vm1615_vm0, %v1614_v0 }
  0x5d   : > { %1397 = vmatprep.subr.bf16.mxu0 %v1614_v0 }
  0x5f   : > { %1382 = vmatmul.mubr.msk.bf16.vlgmr.msra.gmra.mrb[12].mxu1 %vm392_vm3, %v449_v26 }
  0x60   : > { %1392 = vmatpush3.bf16.msra.mxu1 %v1480_v36  ;;  %1393 = vmatprep.mubr.msk.bf16.mxu1 %vm1615_vm0, %v1614_v0 }
  0x61   : > { %1403 = vmatprep.subr.bf16.mxu1 %v1614_v0 }
  0x63   : > { %1388 = vmatmul.mubr.msk.bf16.vlgmr.msra.gmra.mrb[16].mxu0 %vm392_vm3, %v1767_v5 }
  0x64   : > { %1398 = vmatpush3.bf16.msra.mxu0 %v1481_v37  ;;  %1399 = vmatprep.mubr.msk.bf16.mxu0 %vm1615_vm0, %v1614_v0 }
  0x67   : > { %1394 = vmatmul.mubr.msk.bf16.vlgmr.msra.gmra.mrb[16].mxu1 %vm392_vm3, %v385_v15 }
  0x68   : > { %1404 = vmatpush3.bf16.msra.mxu1 %v1482_v38  ;;  %1405 = vmatprep.mubr.msk.bf16.mxu1 %vm1615_vm0, %v1614_v0 }
  0x6b   : > { %1400 = vmatmul.mubr.msk.bf16.vlgmr.msra.gmra.mrb[20].mxu0 %vm392_vm3, %v512_v27 }
  0x6f   : > { %1406 = vmatmul.mubr.msk.bf16.vlgmr.msra.gmra.mrb[20].mxu1 %vm392_vm3, %v739_v34 }
 0x116   : > { %v430_v39 = vpop.f32.mrb[0].mxu0 }
 0x117   : > { %v1341_v40 = vpop.f32.mrb[1].mxu0 }
 0x118   : > { %v433_v41 = vpop.f32.mrb[2].mxu0 }
 0x119   : > { %v1342_v42 = vpop.f32.mrb[3].mxu0 }
 0x11a   : > { %v493_v43 = vpop.f32.mrb[0].mxu1 }
 0x11b   : > { %v494_v44 = vadd.f32 %v493_v43, %v430_v39  ;;  %v1347_v45 = vpop.f32.mrb[1].mxu1 }
 0x11c   : > { %v496_v46 = vpop.f32.mrb[2].mxu1 }
 0x11d   : > { %v497_v47 = vadd.f32 %v496_v46, %v433_v41  ;;  %v1348_v48 = vpop.f32.mrb[3].mxu1 }
 0x11e   : > { %v556_v49 = vpop.f32.mrb[4].mxu0 }
 0x11f   : > { %v563_v51 = vadd.f32 %v556_v49, %v494_v44  ;;  %v1353_v52 = vpop.f32.mrb[5].mxu0 }
 0x120   : > { %v559_v53 = vpop.f32.mrb[6].mxu0 }
 0x121   : > { %v572_v54 = vadd.f32 %v1267_v50, %v563_v51  ;;  %v564_v55 = vadd.f32 %v559_v53, %v497_v47  ;;  %v1354_v56 = vpop.f32.mrb[7].mxu0 }
 0x122   : > { %v624_v57 = vpop.f32.mrb[4].mxu1 }
 0x123   : > { %v574_v58 = vmax.f32 %v572_v54, 0.0  ;;  %v573_v59 = vadd.f32 %v1267_v50, %v564_v55  ;;  %v1359_v60 = vpop.f32.mrb[5].mxu1 }
 0x124   : > { %v627_v61 = vpop.f32.mrb[6].mxu1 }
 0x125   : > { %577 = vst.msk [vmem:[%s344_s16] sm:$0xff] %vm576_vm6, %v574_v58  ;;  %v575_v62 = vmax.f32 %v573_v59, 0.0  ;;  %v1360_v63 = vpop.f32.mrb[7].mxu1 }
 0x126   : > { %v674_v0 = vpop.f32.mrb[8].mxu0 }
 0x127   : > { %578 = vst.msk [vmem:[%s344_s16 + $0x8] sm:$0xff] %vm576_vm6, %v575_v62  ;;  %v675_v1 = vadd.f32 %v674_v0, %v624_v57  ;;  %v1365_v2 = vpop.f32.mrb[9].mxu0 }
 0x128   : > { %v677_v3 = vpop.f32.mrb[10].mxu0 }
 0x129   : > { %1524 = shalt.err (!%p1521_p7)
}
 0x12a   : > { %s1525_s16 = scalar_lea.hbm %s1860_s26, 256  ;;  %s1529_s29 = scalar_lea.hbm %s1968_s7, 512 }
 0x12b   : > { %p1526_p8 = scmp.ne.s32.totalorder %s1860_s26, %s1525_s16  ;;  %p1530_p1 = scmp.lt.u32.totalorder %s1860_s26, %s1968_s7 }
 0x12c   : > { %p1531_p0 = scmp.lt.u32.totalorder %s1529_s29, %s1525_s16  ;;  %p1533_p6 = scmp.lt.u32.totalorder %s1525_s16, %s1860_s26 }
 0x12d   : > { %p1527_p11 = pnand %p1526_p8, %p1984_p9 }
 0x12e   : > { %p1532_p5 = por %p1531_p0, %p1530_p1 }
 0x12f   : > { %p1528_p13 = pneg %p1527_p11 }
 0x130   : > { %p1534_p10 = por %p1533_p6, %p1532_p5 }
 0x132   : > { %p1535_p12 = pnand %p1534_p10, %p1528_p13 }
 0x134   : > { %1538 = shalt.err (!%p1535_p12)
}
 0x135   : > { %s1976_s27 = smov 128   ;;  %s1618_s25 = smov 8   ;;  %v678_v4 = vadd.f32 %v677_v3, %v627_v61  ;;  %v1366_v5 = vpop.f32.mrb[11].mxu0  ;;  %v724_v6 = vpop.f32.mrb[8].mxu1  ;;  %v1282_v13 = vld [vmem:[%s1965_s4] ss:$0 sm:$0xff] }
 0x136   : > { %s1985_s24 = scalar_lea.sflag [#allocation4], %s1846_s23  ;;  %v731_v7 = vadd.f32 %v724_v6, %v675_v1  ;;  %v1371_v8 = vpop.f32.mrb[9].mxu1  ;;  %v783_v12 = vpop.f32.mrb[12].mxu0  ;;  %s1310_s16 = sshll.u32 %s1759_s21, 4  ;;  %vm804_vm7 = vcmask 260096  }
 0x137   : > { %1414 = dma.vmem_to_hbm [thread:$0]  (%p1984_p9), %s1862_s17, 256, %s1860_s26, %s1985_s24, %s1976_s27, %s1976_s27, %s1618_s25   ;;  %v727_v9 = vpop.f32.mrb[10].mxu1  ;;  %v1377_v15 = vpop.f32.mrb[13].mxu0 }
 0x138   : > { %v732_v10 = vadd.f32 %v727_v9, %v678_v4  ;;  %v1372_v11 = vpop.f32.mrb[11].mxu1  ;;  %v790_v14 = vadd.f32 %v783_v12, %v731_v7  ;;  %v786_v16 = vpop.f32.mrb[14].mxu0  ;;  %s368_s29 = scalar_lea.vmem %s1969_s8, %s1310_s16  ;;  %v1301_v46 = vld [vmem:[%s1967_s6] ss:$0 sm:$0xff]  ;;  %s1986_s24 = sshll.u32 %s1846_s23, 4 }
 0x139   : > { %v1378_v19 = vpop.f32.mrb[15].mxu0  ;;  %v851_v20 = vpop.f32.mrb[12].mxu1  ;;  %s358_s14 = scalar_lea.vmem [#allocation6], %s1986_s24  ;;  %s1987_s16 = sshll.u32 %s1691_s13, 8 }
 0x13a   : > { %v799_v17 = vadd.f32 %v1282_v13, %v790_v14  ;;  %v791_v18 = vadd.f32 %v786_v16, %v732_v10  ;;  %v1383_v23 = vpop.f32.mrb[13].mxu1  ;;  %v900_v27 = vpop.f32.mrb[16].mxu0  ;;  %s1119_s28 = sshll.u32 %s358_s14, 4  ;;  %s1087_s21 = scalar_lea.sflag [#allocation7], %s1846_s23  ;;  %s1914_s28 = int_to_ptr.vmem [resolvable:$true] %s1119_s28 }
 0x13b   : > { %v854_v24 = vpop.f32.mrb[14].mxu1  ;;  %v901_v28 = vadd.f32 %v900_v27, %v851_v20  ;;  %v1389_v29 = vpop.f32.mrb[17].mxu0  ;;  %s1539_s22 = scalar_lea.vmem %s1914_s28, 256  ;;  %s1619_s24 = smov [#allocation6]  }
 0x13c   : > { %v801_v21 = vmax.f32 %v799_v17, 0.0  ;;  %v800_v22 = vadd.f32 %v1282_v13, %v791_v18  ;;  %v1384_v26 = vpop.f32.mrb[15].mxu1  ;;  %v903_v30 = vpop.f32.mrb[18].mxu0  ;;  %p1540_p2 = scmp.ne.s32.totalorder %s1914_s28, %s1539_s22  ;;  %s1543_s13 = sshll.u32 %s1619_s24, 4  ;;  %s1544_s13 = int_to_ptr.vmem [resolvable:$false] %s1543_s13 }
 0x13d   : > { %v904_v31 = vadd.f32 %v903_v30, %v854_v24  ;;  %v1390_v32 = vpop.f32.mrb[19].mxu0  ;;  %v950_v33 = vpop.f32.mrb[16].mxu1  ;;  %s1545_s27 = scalar_lea.vmem %s1544_s13, 512  ;;  %p1546_p7 = scmp.lt.s32.totalorder %s1914_s28, %s1544_s13 }
 0x13e   : > { %803 = vst.msk [vmem:[%s368_s29] sm:$0xff] %vm576_vm6, %v801_v21  ;;  %v802_v25 = vmax.f32 %v800_v22, 0.0  ;;  %v957_v34 = vadd.f32 %v950_v33, %v901_v28  ;;  %v1395_v35 = vpop.f32.mrb[17].mxu1  ;;  %v1002_v39 = vpop.f32.mrb[20].mxu0  ;;  %p1541_p3 = pnand %p1540_p2, %p1984_p9  ;;  %p1547_p8 = scmp.lt.s32.totalorder %s1545_s27, %s1539_s22 }
 0x13f   : > { %v953_v36 = vpop.f32.mrb[18].mxu1  ;;  %v1401_v41 = vpop.f32.mrb[21].mxu0 }
 0x140   : > { %805 = vst.msk [vmem:[%s368_s29 + $0x8] sm:$0x7f] %vm804_vm7, %v802_v25  ;;  %v958_v37 = vadd.f32 %v953_v36, %v904_v31  ;;  %v1396_v38 = vpop.f32.mrb[19].mxu1  ;;  %v1009_v40 = vadd.f32 %v1002_v39, %v957_v34  ;;  %v1005_v42 = vpop.f32.mrb[22].mxu0  ;;  %s1912_s29 = scalar_lea.hbm %s1970_s9, %s1987_s16  ;;  %p1542_p4 = pneg %p1541_p3 }
 0x141   : > { %v1402_v44 = vpop.f32.mrb[23].mxu0  ;;  %p1548_p11 = por %p1547_p8, %p1546_p7 }
 0x142   : > { %v1010_v43 = vadd.f32 %v1005_v42, %v958_v37  ;;  %v1054_v45 = vpop.f32.mrb[20].mxu1 }
 0x143   : > { %v1061_v47 = vadd.f32 %v1054_v45, %v1009_v40  ;;  %v1407_v48 = vpop.f32.mrb[21].mxu1  ;;  %p1549_p13 = pnand %p1548_p11, %p1542_p4 }
 0x144   : > { %v1057_v49 = vpop.f32.mrb[22].mxu1 }
 0x145   : > { %v1070_v50 = vadd.f32 %v1301_v46, %v1061_v47  ;;  %v1062_v51 = vadd.f32 %v1057_v49, %v1010_v43  ;;  %v1408_v52 = vpop.f32.mrb[23].mxu1 }
 0x147   : > { %v1072_v53 = vmax.f32 %v1070_v50, 0.0  ;;  %v1071_v54 = vadd.f32 %v1301_v46, %v1062_v51 }
 0x149   : > { %1074 = vst.msk [vmem:[%s358_s14] sm:$0xff] %vm576_vm6, %v1072_v53  ;;  %v1073_v55 = vmax.f32 %v1071_v54, 0.0 }
 0x14b   : > { %1075 = vst.msk [vmem:[%s358_s14 + $0x8] sm:$0xff] %vm576_vm6, %v1073_v55 }
 0x14c   : > { %1552 = shalt.err (!%p1549_p13)
}
 0x14d   : > { %s1553_s14 = scalar_lea.hbm %s1912_s29, 256  ;;  %s1557_s26 = scalar_lea.hbm %s1970_s9, 512 }
 0x14e   : > { %p1554_p1 = scmp.ne.s32.totalorder %s1912_s29, %s1553_s14  ;;  %p1558_p6 = scmp.lt.u32.totalorder %s1912_s29, %s1970_s9 }
 0x14f   : > { %p1559_p10 = scmp.lt.u32.totalorder %s1557_s26, %s1553_s14  ;;  %p1561_p2 = scmp.lt.u32.totalorder %s1553_s14, %s1912_s29 }
 0x150   : > { %p1555_p0 = pnand %p1554_p1, %p1984_p9 }
 0x151   : > { %p1560_p12 = por %p1559_p10, %p1558_p6 }
 0x152   : > { %p1556_p5 = pneg %p1555_p0 }
 0x153   : > { %p1562_p3 = por %p1561_p2, %p1560_p12 }
 0x155   : > { %p1563_p4 = pnand %p1562_p3, %p1556_p5 }
 0x157   : > { %1566 = shalt.err (!%p1563_p4)
}
 0x158   : > { %s1988_s27 = smov 128  }
 0x159   : > { %1415 = dma.vmem_to_hbm [thread:$0]  (%p1984_p9), %s1914_s28, 256, %s1912_s29, %s1087_s21, %s1988_s27, %s1988_s27, %s1618_s25  }
 0x15a PF: > { %p1431_p7 = scmp.ge.s32.totalorder %s1609_s12, 2  ;;  %s1134_s22 = sand.u32 1, %s1597_s30  }
 0x15b   : > { %p1989_p8 = scmp.ne.s32.totalorder %s1978_s20, 0  ;;  %s1135_s14 = scalar_lea.sflag [#allocation4], %s1134_s22 }
 0x15d   : > { %p1423_p11 = pnand %p1431_p7, %p1989_p8 }
 0x15f   : > { %1588 = dma.done.wait (!%p1423_p11), %s1135_s14, 256  }
 0x160   : > { %1590 = vsyncadd (!%p1423_p11), %s1135_s14, 4294967040  ;;  %s1152_s19 = scalar_lea.sflag [#allocation7], %s1134_s22 }
 0x161   : > { %1592 = dma.done.wait (!%p1423_p11), %s1152_s19, 256  }
 0x162   : > { %1594 = vsyncadd (!%p1423_p11), %s1152_s19, 4294967040  ;;  %p24_p9 = scmp.ge.s32.totalorder %s1695_s15, 4   ;;  %s1990_s30 = smov %s1601_s10 }
 0x163   : > { %s1991_s10 = smov %s1605_s11  ;;  %s1992_s11 = smov %s1706_s18 }
 0x164   : > { %s1993_s12 = smov %s1695_s15  ;;  %26 = sbr.rel (!%p24_p9) target bundleno = 6 (0x6), region = 126 }
 0x16b   :  { %1157 = vsyncpa [#allocation3], 1 }
 0x16c   :  { %1159 = vsyncpa [#allocation3 + $0x1], 1 }
 0x16d   :  { %1160 = vsyncpa [#allocation4], 1 }
 0x16e   :  { %1162 = vsyncpa [#allocation4 + $0x1], 1 }
 0x16f   :  { %1163 = vsyncpa [#allocation7], 1 }
 0x170   :  { %1165 = vsyncpa [#allocation7 + $0x1], 1 }

</bundles_post_ra>
